<compile_context>
chip_gen: v6e
topology: v6e:2x2x1
jax: 0.10.0
libtpu: 0.0.40
codegen_flags: <defaults>
</compile_context>

<pallas_src>
import math
from functools import partial

import jax
import jax.numpy as jnp
from jax import random
from jax.experimental import pallas as pl
from jax.experimental.pallas import tpu as pltpu


# ----------------------------------------------------------------------------
# Small helpers
# ----------------------------------------------------------------------------
def _round_up(x, m):
    return ((x + m - 1) // m) * m


def _first_divisor(n, cands):
    for c in cands:
        if n % c == 0:
            return c
    return cands[-1]


def _apply_act(x, act):
    if act == "silu":
        return x * jax.nn.sigmoid(x)
    if act == "sigmoid":
        return jax.nn.sigmoid(x)
    return x


def _bn_fold(bn, eps):
    """Eval-mode BatchNorm -> per-channel (scale, bias)."""
    scale = bn["gamma"] / jnp.sqrt(bn["var"] + eps)
    bias = bn["beta"] - bn["mean"] * scale
    return scale, bias


# ----------------------------------------------------------------------------
# Unified fused matmul kernel (bf16 MXU, f32 accumulate)
#   y[b] = act( (A[b] * gate[b]) @ B + bias ) (+ residual[b])
# ----------------------------------------------------------------------------
def _mm_kernel(*refs, nk, act, has_gate, has_res):
    if nk > 1:
        refs, acc_ref = refs[:-1], refs[-1]
    else:
        acc_ref = None
    a_ref, b_ref, bias_ref = refs[0], refs[1], refs[2]
    idx = 3
    g_ref = refs[idx] if has_gate else None
    idx += 1 if has_gate else 0
    r_ref = refs[idx] if has_res else None
    idx += 1 if has_res else 0
    o_ref = refs[idx]

    a = a_ref[0]                                   # (tm, tk) bf16
    if has_gate:
        a = (a.astype(jnp.float32) * g_ref[0]).astype(jnp.bfloat16)
    part = jnp.dot(a, b_ref[...], preferred_element_type=jnp.float32)

    def _finish(acc):
        y = _apply_act(acc + bias_ref[...], act)
        if has_res:
            # residual added after (no-)activation; guarded by assert in wrapper
            y = y + r_ref[0].astype(jnp.float32)
        o_ref[0] = y.astype(o_ref.dtype)

    if nk == 1:
        _finish(part)                              # no-scratch fast path
    else:
        @pl.when(pl.program_id(3) == 0)
        def _():
            acc_ref[...] = jnp.zeros_like(acc_ref)

        acc_ref[...] += part

        @pl.when(pl.program_id(3) == nk - 1)
        def _():
            _finish(acc_ref[...])


def fused_matmul(a, b, bias=None, act="none", gate=None, residual=None,
                 out_dtype=jnp.bfloat16):
    """a: (B, M, K), b: (K, N), bias: (N,), gate: (B, K), residual: (B, M, N)."""
    assert residual is None or act == "none", "residual is fused post-activation only for act='none'"
    B, M, K = a.shape
    K2, N = b.shape
    assert K == K2

    Kp = _round_up(K, 128)
    Np = _round_up(N, 128)
    m8 = _round_up(M, 8)
    tm = m8 if m8 <= 256 else 256                  # cap 256 -> >=2 tiles for megacore
    Mp = _round_up(M, tm)
    tk = _first_divisor(Kp, (512, 384, 256, 128))
    tn = _first_divisor(Np, (256, 128))
    nk = Kp // tk

    a_p = jnp.pad(a.astype(jnp.bfloat16), ((0, 0), (0, Mp - M), (0, Kp - K)))
    b_p = jnp.pad(b.astype(jnp.bfloat16), ((0, Kp - K), (0, Np - N)))
    if bias is None:
        bias_p = jnp.zeros((1, Np), jnp.float32)
    else:
        bias_p = jnp.pad(bias.reshape(1, N).astype(jnp.float32), ((0, 0), (0, Np - N)))

    args = [a_p, b_p, bias_p]
    in_specs = [
        pl.BlockSpec((1, tm, tk), lambda bb, i, j, kk: (bb, i, kk)),
        pl.BlockSpec((tk, tn), lambda bb, i, j, kk: (kk, j)),
        pl.BlockSpec((1, tn), lambda bb, i, j, kk: (0, j)),
    ]
    has_gate = gate is not None
    if has_gate:
        g_p = jnp.pad(gate.astype(jnp.float32).reshape(B, 1, K),
                      ((0, 0), (0, 0), (0, Kp - K)))
        args.append(g_p)
        in_specs.append(pl.BlockSpec((1, 1, tk), lambda bb, i, j, kk: (bb, 0, kk)))
    has_res = residual is not None
    if has_res:
        r_p = jnp.pad(residual.astype(jnp.bfloat16), ((0, 0), (0, Mp - M), (0, Np - N)))
        args.append(r_p)
        in_specs.append(pl.BlockSpec((1, tm, tn), lambda bb, i, j, kk: (bb, i, j)))

    kernel = partial(_mm_kernel, nk=nk, act=act, has_gate=has_gate, has_res=has_res)
    scratch = [pltpu.VMEM((tm, tn), jnp.float32)] if nk > 1 else []

    out = pl.pallas_call(
        kernel,
        out_shape=jax.ShapeDtypeStruct((B, Mp, Np), out_dtype),
        grid=(B, Mp // tm, Np // tn, nk),
        in_specs=in_specs,
        out_specs=pl.BlockSpec((1, tm, tn), lambda bb, i, j, kk: (bb, i, j)),
        scratch_shapes=scratch,
        compiler_params=pltpu.CompilerParams(
            dimension_semantics=("parallel", "parallel", "parallel", "arbitrary")),
        cost_estimate=pl.CostEstimate(
            flops=int(2 * B * Mp * Np * Kp),
            transcendentals=int(B * Mp * Np) if act in ("silu", "sigmoid") else 0,
            bytes_accessed=int(2 * (B * Mp * Kp + Kp * Np + 2 * B * Mp * Np))),
    )(*args)

    if Mp != M or Np != N:
        out = out[:, :M, :N]
    return out


# ----------------------------------------------------------------------------
# Depthwise conv (+folded BN)(+SiLU) kernel with fused SE squeeze  -- VPU
#   Strided convs handled natively via phase (space-to-depth) decomposition.
# ----------------------------------------------------------------------------
def _dw_kernel(x_ref, w_ref, b_ref, o_ref, gap_ref, *, k, s, act):
    # x_ref: (1, s*s, Hq, Wq, tc) bf16 phase-decomposed SAME-padded input
    # w_ref: (k*k, tc) f32 BN-folded weights; b_ref: (1, tc) f32 bias
    # o_ref: (1, oh, ow, tc) bf16 output; gap_ref: (1, 1, tc) f32 spatial mean
    oh, ow, tc = o_ref.shape[1], o_ref.shape[2], o_ref.shape[3]
    gap = jnp.zeros((1, tc), jnp.float32)
    r0 = 0
    while r0 < oh:                                  # static row-band loop
        rows = min(8, oh - r0)
        acc = jnp.zeros((rows, ow, tc), jnp.float32)
        for di in range(k):                         # static k*k tap loops
            qi, ri = di // s, di % s
            for dj in range(k):
                qj, rj = dj // s, dj % s
                t = di * k + dj
                tap = x_ref[0, ri * s + rj, qi + r0: qi + r0 + rows, qj: qj + ow, :]
                acc = acc + tap.astype(jnp.float32) * w_ref[t:t + 1, :]
        y = _apply_act(acc + b_ref[...], act)
        o_ref[0, r0: r0 + rows] = y.astype(o_ref.dtype)
        gap = gap + jnp.sum(jnp.sum(y, axis=1), axis=0)[None, :]
        r0 += rows
    gap_ref[0] = gap * (1.0 / float(oh * ow))


def dwconv_bn_act(x, w, bias, stride, act="silu"):
    """Depthwise conv with BN folded into (w, bias); fused activation and SE squeeze.

    Returns (activated output NHWC bf16, per-channel spatial mean (N, C) f32).
    """
    k = w.shape[0]
    s = stride
    N, H, W, C = x.shape
    oh, ow = -(-H // s), -(-W // s)
    q = (k - 1) // s
    Hq, Wq = oh + q, ow + q                         # per-phase plane extent
    ph = max((oh - 1) * s + k - H, 0)
    pw = max((ow - 1) * s + k - W, 0)
    pt, plft = ph // 2, pw // 2                     # TF-style SAME padding offsets

    xp = jnp.pad(x.astype(jnp.bfloat16),
                 ((0, 0), (pt, Hq * s - H - pt), (plft, Wq * s - W - plft), (0, 0)))
    # space-to-depth: phase (a, b) plane holds xp[:, a::s, b::s, :]  (identity for s=1)
    x5 = (xp.reshape(N, Hq, s, Wq, s, C)
            .transpose(0, 2, 4, 1, 3, 5)
            .reshape(N, s * s, Hq, Wq, C))

    w2 = w.reshape(k * k, C).astype(jnp.float32)
    b2 = bias.reshape(1, C).astype(jnp.float32)
    if C <= 128:
        Cp, tc = C, C
    else:
        Cp, tc = _round_up(C, 128), 128
    if Cp != C:
        x5 = jnp.pad(x5, ((0, 0), (0, 0), (0, 0), (0, 0), (0, Cp - C)))
        w2 = jnp.pad(w2, ((0, 0), (0, Cp - C)))
        b2 = jnp.pad(b2, ((0, 0), (0, Cp - C)))

    out, gap = pl.pallas_call(
        partial(_dw_kernel, k=k, s=s, act=act),
        out_shape=(jax.ShapeDtypeStruct((N, oh, ow, Cp), jnp.bfloat16),
                   jax.ShapeDtypeStruct((N, 1, Cp), jnp.float32)),
        grid=(N, Cp // tc),
        in_specs=[
            pl.BlockSpec((1, s * s, Hq, Wq, tc), lambda n, c: (n, 0, 0, 0, c)),
            pl.BlockSpec((k * k, tc), lambda n, c: (0, c)),
            pl.BlockSpec((1, tc), lambda n, c: (0, c)),
        ],
        out_specs=(pl.BlockSpec((1, oh, ow, tc), lambda n, c: (n, 0, 0, c)),
                   pl.BlockSpec((1, 1, tc), lambda n, c: (n, 0, c))),
        compiler_params=pltpu.CompilerParams(
            dimension_semantics=("parallel", "parallel")),
    )(x5, w2, b2)

    if Cp != C:
        out = out[..., :C]
        gap = gap[..., :C]
    return out, gap.reshape(N, C)


# ----------------------------------------------------------------------------
# SE gate: both FCs (reduce -> SiLU -> expand -> sigmoid) in one tiny kernel
# ----------------------------------------------------------------------------
def _se_fc_kernel(g_ref, w1_ref, b1_ref, w2_ref, b2_ref, o_ref):
    h = jnp.dot(g_ref[...], w1_ref[...], preferred_element_type=jnp.float32)
    h = h + b1_ref[...]
    h = h * jax.nn.sigmoid(h)                       # SiLU
    y = jnp.dot(h.astype(jnp.bfloat16), w2_ref[...],
                preferred_element_type=jnp.float32)
    y = y + b2_ref[...]
    o_ref[...] = jax.nn.sigmoid(y)                  # gate in f32


def se_gate(g, w1, b1, w2, b2):
    N, mid = g.shape
    nsq = w1.shape[1]
    Bp = _round_up(N, 8)
    midp = _round_up(mid, 128)
    nsqp = _round_up(nsq, 128)
    g_p = jnp.pad(g, ((0, Bp - N), (0, midp - mid))).astype(jnp.bfloat16)
    w1_p = jnp.pad(w1, ((0, midp - mid), (0, nsqp - nsq))).astype(jnp.bfloat16)
    b1_p = jnp.pad(b1.reshape(1, -1).astype(jnp.float32), ((0, 0), (0, nsqp - nsq)))
    w2_p = jnp.pad(w2, ((0, nsqp - nsq), (0, midp - mid))).astype(jnp.bfloat16)
    b2_p = jnp.pad(b2.reshape(1, -1).astype(jnp.float32), ((0, 0), (0, midp - mid)))
    out = pl.pallas_call(
        _se_fc_kernel,
        out_shape=jax.ShapeDtypeStruct((Bp, midp), jnp.float32),
    )(g_p, w1_p, b1_p, w2_p, b2_p)
    return out[:N, :mid]


# ----------------------------------------------------------------------------
# Global average pool (final pooling only; mid-tensor GAP is fused into dw)
# ----------------------------------------------------------------------------
def _gap_kernel(x_ref, o_ref):
    o_ref[...] = jnp.mean(x_ref[...].astype(jnp.float32), axis=1,
                          keepdims=True).astype(o_ref.dtype)


def global_avg_pool(x):
    N, H, W, C = x.shape
    out = pl.pallas_call(
        _gap_kernel,
        out_shape=jax.ShapeDtypeStruct((N, 1, C), jnp.float32),
        grid=(N,),
        in_specs=[pl.BlockSpec((1, H * W, C), lambda n: (n, 0, 0))],
        out_specs=pl.BlockSpec((1, 1, C), lambda n: (n, 0, 0)),
        compiler_params=pltpu.CompilerParams(dimension_semantics=("parallel",)),
    )(x.reshape(N, H * W, C))
    return out.reshape(N, C)


# ----------------------------------------------------------------------------
# Conv plumbing (glue; compute happens in the fused matmul / dw kernels)
# ----------------------------------------------------------------------------
def _same_pad(x, k, s):
    N, H, W, C = x.shape
    oh, ow = -(-H // s), -(-W // s)
    ph = max((oh - 1) * s + k - H, 0)
    pw = max((ow - 1) * s + k - W, 0)
    xp = jnp.pad(x, ((0, 0), (ph // 2, ph - ph // 2),
                     (pw // 2, pw - pw // 2), (0, 0)))
    return xp, oh, ow


def _extract_patches(xp, k, s, oh, ow):
    cols = []
    for i in range(k):
        for j in range(k):
            cols.append(xp[:, i:i + (oh - 1) * s + 1:s, j:j + (ow - 1) * s + 1:s, :])
    return jnp.stack(cols, axis=3)  # (N, oh, ow, k*k, C)


def conv2d_bn_act(x, w, bn, stride, act, eps):
    """Stem conv, weight (kh, kw, Cin, Cout); BN + act fused into the matmul."""
    k, _, cin, cout = w.shape
    scale, bias = _bn_fold(bn, eps)
    w2 = (w * scale).reshape(k * k * cin, cout)
    xp, oh, ow = _same_pad(x, k, stride)
    patches = _extract_patches(xp, k, stride, oh, ow)   # bf16, small Cin blow-up
    Nb = x.shape[0]
    a = patches.reshape(1, Nb * oh * ow, k * k * cin)
    y = fused_matmul(a, w2, bias=bias, act=act)
    return y.reshape(Nb, oh, ow, cout)


def conv1x1_bn_act(x, w, bias, act="none"):
    """Pointwise conv, weight (Cin, Cout) with BN folded; fused epilogue."""
    N, H, W, C = x.shape
    cout = w.shape[1]
    y = fused_matmul(x.reshape(1, N * H * W, C), w, bias=bias, act=act)
    return y.reshape(N, H, W, cout)


def project_conv(x, w, bias, gate=None, residual=None):
    """Project 1x1 conv with SE gate fused into the A-tile and fused residual."""
    N, H, W, C = x.shape
    cout = w.shape[1]
    if gate is None and residual is None:
        return conv1x1_bn_act(x, w, bias, act="none")
    a = x.reshape(N, H * W, C)
    r = residual.reshape(N, H * W, cout) if residual is not None else None
    y = fused_matmul(a, w, bias=bias, act="none", gate=gate, residual=r)
    return y.reshape(N, H, W, cout)


# ----------------------------------------------------------------------------
# EfficientNet configuration / parameter init (deterministic, synthetic)
# ----------------------------------------------------------------------------
def round_filters(filters, gp):
    wc = gp["width_coefficient"]
    if not wc:
        return filters
    divisor = gp["depth_divisor"]
    filters *= wc
    new_f = max(divisor, int(filters + divisor / 2) // divisor * divisor)
    if new_f < 0.9 * filters:
        new_f += divisor
    return int(new_f)


def round_repeats(repeats, gp):
    dc = gp["depth_coefficient"]
    if not dc:
        return repeats
    return int(math.ceil(dc * repeats))


def build_block_configs(blocks_args, gp):
    cfgs = []
    for ba in [dict(b) for b in blocks_args]:
        ba["input_filters"] = round_filters(ba["input_filters"], gp)
        ba["output_filters"] = round_filters(ba["output_filters"], gp)
        ba["num_repeat"] = round_repeats(ba["num_repeat"], gp)
        cfgs.append(dict(ba))
        if ba["num_repeat"] > 1:
            ba["input_filters"] = ba["output_filters"]
            ba["stride"] = 1
        for _ in range(ba["num_repeat"] - 1):
            cfgs.append(dict(ba))
    return cfgs


def conv_init(key, shape, fan_in):
    return random.normal(key, shape, jnp.float32) * (1.0 / math.sqrt(fan_in))


def bn_init(key, c):
    k1, k2, k3, k4 = random.split(key, 4)
    return dict(
        gamma=1.0 + 0.1 * random.normal(k1, (c,), jnp.float32),
        beta=0.1 * random.normal(k2, (c,), jnp.float32),
        mean=0.1 * random.normal(k3, (c,), jnp.float32),
        var=1.0 + 0.1 * jnp.abs(random.normal(k4, (c,), jnp.float32)),
    )


def init_block_params(key, cfg):
    cin, cout = cfg["input_filters"], cfg["output_filters"]
    k, er = cfg["kernel_size"], cfg["expand_ratio"]
    mid = cin * er
    keys = random.split(key, 12)
    p = dict(cfg=cfg)
    if er != 1:
        p["expand_w"] = conv_init(keys[0], (cin, mid), cin)
        p["bn0"] = bn_init(keys[1], mid)
    else:
        p["expand_w"] = None
    p["dw_w"] = conv_init(keys[2], (k, k, mid), k * k)
    p["bn1"] = bn_init(keys[3], mid)
    if cfg["se_ratio"] is not None and 0.0 < cfg["se_ratio"] <= 1.0:
        nsq = max(1, int(cin * cfg["se_ratio"]))
        p["se_reduce_w"] = conv_init(keys[4], (mid, nsq), mid)
        p["se_reduce_b"] = 0.01 * random.normal(keys[5], (nsq,), jnp.float32)
        p["se_expand_w"] = conv_init(keys[6], (nsq, mid), nsq)
        p["se_expand_b"] = 0.01 * random.normal(keys[7], (mid,), jnp.float32)
    else:
        p["se_reduce_w"] = None
    p["project_w"] = conv_init(keys[8], (mid, cout), mid)
    p["bn2"] = bn_init(keys[9], cout)
    return p


def init_model_params(key, in_channels, num_classes, blocks_args, gp):
    cfgs = build_block_configs(blocks_args, gp)
    stem_out = round_filters(32, gp)
    head_out = round_filters(1280, gp)
    keys = random.split(key, 6 + len(cfgs))
    params = {}
    params["stem_w"] = conv_init(keys[0], (3, 3, in_channels, stem_out), 9 * in_channels)
    params["norm0"] = bn_init(keys[1], stem_out)
    params["blocks"] = [init_block_params(keys[6 + i], cfg) for i, cfg in enumerate(cfgs)]
    head_in = cfgs[-1]["output_filters"]
    params["head_w"] = conv_init(keys[2], (head_in, head_out), head_in)
    params["norm1"] = bn_init(keys[3], head_out)
    params["fc_w"] = conv_init(keys[4], (head_out, num_classes), head_out)
    params["fc_b"] = 0.01 * random.normal(keys[5], (num_classes,), jnp.float32)
    return params


# ----------------------------------------------------------------------------
# Forward pass
# ----------------------------------------------------------------------------
def mbconv_forward(x, p, eps):
    cfg = p["cfg"]
    inputs = x
    if p["expand_w"] is not None:
        s0, b0 = _bn_fold(p["bn0"], eps)
        x = conv1x1_bn_act(x, p["expand_w"] * s0[None, :], b0, act="silu")
    s1, b1 = _bn_fold(p["bn1"], eps)
    x, squeezed = dwconv_bn_act(x, p["dw_w"] * s1[None, None, :], b1,
                                cfg["stride"], act="silu")
    gate = None
    if p["se_reduce_w"] is not None:
        gate = se_gate(squeezed, p["se_reduce_w"], p["se_reduce_b"],
                       p["se_expand_w"], p["se_expand_b"])        # (N, mid) f32
    s2, b2 = _bn_fold(p["bn2"], eps)
    w2 = p["project_w"] * s2[None, :]
    use_res = (cfg["id_skip"] and cfg["stride"] == 1
               and cfg["input_filters"] == cfg["output_filters"])
    # drop_connect is identity at inference -> residual fused into matmul epilogue
    x = project_conv(x, w2, b2, gate=gate,
                     residual=inputs if use_res else None)
    return x


def efficientnet_forward(params, x_nchw, eps=1e-3):
    x = jnp.transpose(x_nchw, (0, 2, 3, 1)).astype(jnp.bfloat16)    # NCHW -> NHWC, bf16
    x = conv2d_bn_act(x, params["stem_w"], params["norm0"], stride=2,
                      act="silu", eps=eps)                          # stem + norm0 + SiLU
    for p in params["blocks"]:
        x = mbconv_forward(x, p, eps)
    s, b = _bn_fold(params["norm1"], eps)
    x = conv1x1_bn_act(x, params["head_w"] * s[None, :], b, act="silu")  # head + norm1 + SiLU
    x = global_avg_pool(x)                                          # (N, head_out) f32
    # dropout: identity in eval mode
    logits = fused_matmul(x.reshape(1, x.shape[0], x.shape[1]),
                          params["fc_w"], bias=params["fc_b"], act="none",
                          out_dtype=jnp.float32)                    # _fc
    return logits.reshape(x.shape[0], -1)


# ----------------------------------------------------------------------------
# Main
# ----------------------------------------------------------------------------
BLOCKS_ARGS = [
    dict(num_repeat=1, kernel_size=3, stride=1, expand_ratio=1,
         input_filters=32, output_filters=16, se_ratio=0.25, id_skip=True),
    dict(num_repeat=2, kernel_size=3, stride=2, expand_ratio=6,
         input_filters=16, output_filters=24, se_ratio=0.25, id_skip=True),
]

GLOBAL_PARAMS = dict(
    width_coefficient=0.25, depth_coefficient=1.0, depth_divisor=8,
    dropout_rate=0.2, drop_connect_rate=0.2,
    batch_norm_momentum=0.99, batch_norm_epsilon=1e-3, norm="batch_norm",
)

if __name__ == "__main__":
    key = random.PRNGKey(0)
    pkey, xkey = random.split(key)

    params = init_model_params(pkey, in_channels=3, num_classes=10,
                               blocks_args=BLOCKS_ARGS, gp=GLOBAL_PARAMS)

    # Small NCHW input, matching the PyTorch convention.
    x = random.normal(xkey, (2, 3, 16, 16), jnp.float32)

    out = efficientnet_forward(params, x, eps=GLOBAL_PARAMS["batch_norm_epsilon"])
    out = jax.block_until_ready(out)

    assert out.shape == (2, 10), out.shape
    assert bool(jnp.all(jnp.isfinite(out)))
    print("KERNEL_OK")
</pallas_src>

<mosaic_0001>
module attributes {stable_mosaic.version = 11 : i64} {
  func.func @_mm_kernel(%arg0: i32, %arg1: i32, %arg2: i32, %arg3: i32, %arg4: memref<1x128x128xbf16, #tpu.memory_space<vmem>>, %arg5: memref<128x128xbf16, #tpu.memory_space<vmem>>, %arg6: memref<1x128xf32, #tpu.memory_space<vmem>>, %arg7: memref<1x128x128xbf16, #tpu.memory_space<vmem>>) attributes {dimension_semantics = [#tpu.dimension_semantics<parallel>, #tpu.dimension_semantics<parallel>, #tpu.dimension_semantics<parallel>, #tpu.dimension_semantics<arbitrary>], iteration_bounds = array<i64: 1, 1, 1, 1>, scalar_prefetch = 0 : i64, scratch_operands = 0 : i64, tpu.core_type = #tpu.core_type<tc>, window_params = [{transform_indices = @transform_0, window_bounds = array<i64: 1, 128, 128>}, {transform_indices = @transform_1, window_bounds = array<i64: 128, 128>}, {transform_indices = @transform_2, window_bounds = array<i64: 1, 128>}, {transform_indices = @transform_3, window_bounds = array<i64: 1, 128, 128>}]} {
    %c0 = arith.constant 0 : index
    %c0_0 = arith.constant 0 : index
    %c0_1 = arith.constant 0 : index
    %0 = vector.load %arg4[%c0, %c0_0, %c0_1] : memref<1x128x128xbf16, #tpu.memory_space<vmem>>, vector<1x128x128xbf16>
    %1 = vector.shape_cast %0 : vector<1x128x128xbf16> to vector<128x128xbf16>
    %c0_2 = arith.constant 0 : index
    %c0_3 = arith.constant 0 : index
    %2 = vector.load %arg5[%c0_2, %c0_3] : memref<128x128xbf16, #tpu.memory_space<vmem>>, vector<128x128xbf16>
    %cst = arith.constant dense<0.000000e+00> : vector<128x128xf32>
    %3 = tpu.matmul %1, %2, %cst {dimension_numbers = #tpu.dot_dimension_numbers<[1], [0], [0], [1], [0, 0, 1, 1], [], []>} : vector<128x128xbf16>, vector<128x128xbf16>, vector<128x128xf32> -> vector<128x128xf32>
    %c0_4 = arith.constant 0 : index
    %c0_5 = arith.constant 0 : index
    %4 = vector.load %arg6[%c0_4, %c0_5] : memref<1x128xf32, #tpu.memory_space<vmem>>, vector<1x128xf32>
    %5 = vector.broadcast %4 : vector<1x128xf32> to vector<128x128xf32>
    %6 = arith.addf %3, %5 : vector<128x128xf32>
    %7 = arith.negf %6 : vector<128x128xf32>
    %8 = math.exp %7 : vector<128x128xf32>
    %cst_6 = arith.constant 1.000000e+00 : f32
    %9 = vector.broadcast %cst_6 : f32 to vector<128x128xf32>
    %10 = arith.addf %9, %8 : vector<128x128xf32>
    %11 = arith.divf %9, %10 : vector<128x128xf32>
    %12 = arith.mulf %6, %11 : vector<128x128xf32>
    %13 = arith.truncf %12 : vector<128x128xf32> to vector<128x128xbf16>
    %c0_7 = arith.constant 0 : index
    %c0_8 = arith.constant 0 : index
    %c0_9 = arith.constant 0 : index
    %14 = vector.load %arg7[%c0_7, %c0_8, %c0_9] : memref<1x128x128xbf16, #tpu.memory_space<vmem>>, vector<1x128x128xbf16>
    %15 = vector.shape_cast %14 : vector<1x128x128xbf16> to vector<128x128xbf16>
    %16 = vector.shape_cast %13 : vector<128x128xbf16> to vector<1x128x128xbf16>
    tpu.vector_store %arg7[%c0_7, %c0_8, %c0_9], %16 {strides = array<i32>} : memref<1x128x128xbf16, #tpu.memory_space<vmem>>, vector<1x128x128xbf16>,
    return
  }
  func.func @transform_0(%arg0: i32, %arg1: i32, %arg2: i32, %arg3: i32) -> (i32, i32, i32) {
    %c0_i32 = arith.constant 0 : i32
    return %arg0, %arg1, %arg3 : i32, i32, i32
  }
  func.func @transform_1(%arg0: i32, %arg1: i32, %arg2: i32, %arg3: i32) -> (i32, i32) {
    %c0_i32 = arith.constant 0 : i32
    return %arg3, %arg2 : i32, i32
  }
  func.func @transform_2(%arg0: i32, %arg1: i32, %arg2: i32, %arg3: i32) -> (i32, i32) {
    %c0_i32 = arith.constant 0 : i32
    %c0_i32_0 = arith.constant 0 : i32
    return %c0_i32, %arg2 : i32, i32
  }
  func.func @transform_3(%arg0: i32, %arg1: i32, %arg2: i32, %arg3: i32) -> (i32, i32, i32) {
    %c0_i32 = arith.constant 0 : i32
    return %arg0, %arg1, %arg2 : i32, i32, i32
  }
}

</mosaic_0001>

<bundles_post_ra>
// kernel: tpu_custom_call.1
= control target key start
LH: loop header
LB: loop body
LE: loop exit
PB: predicated region body
PF: predicated region fallthrough
CT: control target
= control target key end

     0   :  { %8 = vsyncpa [#allocation3], 0  ;;  %s923_s0 = inlined_call_operand.hbm [shape: bf16[1,128,128], index: 0, kind: input, shape index: {}]   ;;  %s924_s1 = inlined_call_operand.hbm [shape: bf16[128,128], index: 1, kind: input, shape index: {}]   ;;  %s925_s2 = inlined_call_operand.vmem [shape: f32[1,128], index: 2, kind: input, shape index: {}]   ;;  %s926_s3 = inlined_call_operand.hbm [shape: bf16[1,128,128], index: 3, kind: output, shape index: {}]  }
   0x1   :  { %9 = vsyncpa [#allocation6], 0 }
   0x2   :  { %10 = vsyncpa [#allocation4], 0  ;;  %s813_s12 = smov [#allocation2]  }
   0x3   :  { %s16_s13 = sshll.u32 %s813_s12, 4  ;;  %s17_s13 = int_to_ptr.vmem [resolvable:$true] %s16_s13 }
   0x4   :  { %s755_s14 = scalar_lea.vmem %s17_s13, 1024  ;;  %p760_p1 = scmp.lt.s32.totalorder %s17_s13, %s17_s13 }
   0x5   :  { %p756_p0 = scmp.ne.s32.totalorder %s17_s13, %s755_s14  ;;  %p761_p2 = scmp.lt.s32.totalorder %s755_s14, %s755_s14 }
   0x7   :  { %p762_p3 = por %p761_p2, %p760_p1 }
   0x9   :  { %p763_p4 = pnand %p762_p3, %p756_p0 }
   0xb   :  { %766 = shalt.err (!%p763_p4)
}
   0xc   :  { %s814_s15 = smov 64   ;;  %s815_s16 = smov 4  }
   0xd   :  { %22 = dma.hbm_to_vmem [thread:$0]  %s923_s0, 1024, %s17_s13, [#allocation3], %s814_s15, %s814_s15, %s815_s16  }
   0xe   :  { %s816_s19 = smov [#allocation5]  }
   0xf   :  { %s28_s20 = sshll.u32 %s816_s19, 4  ;;  %s29_s20 = int_to_ptr.vmem [resolvable:$true] %s28_s20 }
  0x10   :  { %s775_s21 = scalar_lea.vmem %s29_s20, 1024  ;;  %p780_p6 = scmp.lt.s32.totalorder %s29_s20, %s29_s20 }
  0x11   :  { %p776_p5 = scmp.ne.s32.totalorder %s29_s20, %s775_s21  ;;  %p781_p7 = scmp.lt.s32.totalorder %s775_s21, %s775_s21 }
  0x13   :  { %p782_p8 = por %p781_p7, %p780_p6 }
  0x15   :  { %p783_p9 = pnand %p782_p8, %p776_p5 }
  0x17   :  { %786 = shalt.err (!%p783_p9)
}
  0x18   :  { %34 = dma.hbm_to_vmem [thread:$0]  %s924_s1, 1024, %s29_s20, [#allocation6], %s814_s15, %s814_s15, %s815_s16  }
  0x19   :  { %807 = dma.done.wait [#allocation3], 1024  }
  0x1a   :  { %808 = vsyncadd [#allocation3], 4294966272 }
  0x1b   :  { %809 = dma.done.wait [#allocation6], 1024  }
  0x1c   :  { %810 = vsyncadd [#allocation6], 4294966272  ;;  %v667_v0 = vld [vmem:[#allocation5 + $0x38] sm:$0xff]   ;;  %v668_v1 = vld [vmem:[#allocation5 + $0x30] sm:$0xff]  }
  0x1d   :  { %614 = vmatprep.subr.bf16.mxu0 %v667_v0  ;;  %646 = vmatprep.subr.bf16.mxu1 %v667_v0  ;;  %v669_v2 = vld [vmem:[#allocation5 + $0x28] sm:$0xff]   ;;  %v670_v3 = vld [vmem:[#allocation5 + $0x20] sm:$0xff]   ;;  %v671_v6 = vld [vmem:[#allocation5 + $0x18] sm:$0xff]  }
  0x1e   :  { %615 = vmatpush3.bf16.msra.mxu0 %v667_v0  ;;  %654 = vmatpush3.bf16.msra.mxu1 %v667_v0  ;;  %v675_v4 = vld [vmem:[#allocation2] sm:$0xff]   ;;  %v672_v7 = vld [vmem:[#allocation5 + $0x10] sm:$0xff]   ;;  %v673_v8 = vld [vmem:[#allocation5 + $0x8] sm:$0xff]  }
  0x1f   :  { %616 = vmatprep.subr.bf16.mxu0 %v668_v1  ;;  %647 = vmatprep.subr.bf16.mxu1 %v668_v1  ;;  %v676_v5 = vld [vmem:[#allocation2 + $0x20] sm:$0xff]   ;;  %v677_v10 = vld [vmem:[#allocation2 + $0x8] sm:$0xff]   ;;  %v679_v12 = vld [vmem:[#allocation2 + $0x10] sm:$0xff]  }
  0x20   :  { %630 = vmatprep.mubr.bf16.mxu0 %v675_v4  ;;  %638 = vmatprep.mubr.bf16.mxu1 %v676_v5  ;;  %v674_v9 = vld [vmem:[#allocation5] sm:$0xff]   ;;  %v678_v11 = vld [vmem:[#allocation2 + $0x28] sm:$0xff]   ;;  %v680_v13 = vld [vmem:[#allocation2 + $0x30] sm:$0xff]  }
  0x21   :  { %v681_v14 = vld [vmem:[#allocation2 + $0x18] sm:$0xff]   ;;  %v486_v16 = vld [vmem:[%s925_s2] ss:$0 sm:$0xff]  ;;  %s817_s2 = smov [#allocation7]  }
  0x22   :  { %617 = vmatpush3.bf16.msra.mxu0 %v668_v1  ;;  %655 = vmatpush3.bf16.msra.mxu1 %v668_v1  ;;  %v682_v15 = vld [vmem:[#allocation2 + $0x38] sm:$0xff]   ;;  %s473_s24 = sshll.u32 %s817_s2, 4  ;;  %s474_s24 = int_to_ptr.vmem [resolvable:$true] %s473_s24 }
  0x23   :  { %618 = vmatprep.subr.bf16.mxu0 %v669_v2  ;;  %648 = vmatprep.subr.bf16.mxu1 %v669_v2  ;;  %s787_s25 = scalar_lea.vmem %s474_s24, 1024  ;;  %p792_p11 = scmp.lt.s32.totalorder %s474_s24, %s474_s24 }
  0x24   :  { %p788_p10 = scmp.ne.s32.totalorder %s474_s24, %s787_s25  ;;  %p793_p12 = scmp.lt.s32.totalorder %s787_s25, %s787_s25 }
  0x26   :  { %619 = vmatpush3.bf16.msra.mxu0 %v669_v2  ;;  %656 = vmatpush3.bf16.msra.mxu1 %v669_v2  ;;  %p794_p13 = por %p793_p12, %p792_p11 }
  0x27   :  { %620 = vmatprep.subr.bf16.mxu0 %v670_v3  ;;  %649 = vmatprep.subr.bf16.mxu1 %v670_v3 }
  0x28   :  { %p795_p0 = pnand %p794_p13, %p788_p10 }
  0x2a   :  { %621 = vmatpush3.bf16.msra.mxu0 %v670_v3  ;;  %657 = vmatpush3.bf16.msra.mxu1 %v670_v3 }
  0x2b   :  { %622 = vmatprep.subr.bf16.mxu0 %v671_v6  ;;  %650 = vmatprep.subr.bf16.mxu1 %v671_v6 }
  0x2e   :  { %623 = vmatpush3.bf16.msra.mxu0 %v671_v6  ;;  %658 = vmatpush3.bf16.msra.mxu1 %v671_v6 }
  0x2f   :  { %624 = vmatprep.subr.bf16.mxu0 %v672_v7  ;;  %651 = vmatprep.subr.bf16.mxu1 %v672_v7 }
  0x32   :  { %625 = vmatpush3.bf16.msra.mxu0 %v672_v7  ;;  %659 = vmatpush3.bf16.msra.mxu1 %v672_v7 }
  0x33   :  { %626 = vmatprep.subr.bf16.mxu0 %v673_v8  ;;  %652 = vmatprep.subr.bf16.mxu1 %v673_v8 }
  0x36   :  { %627 = vmatpush3.bf16.msra.mxu0 %v673_v8  ;;  %660 = vmatpush3.bf16.msra.mxu1 %v673_v8 }
  0x37   :  { %628 = vmatprep.subr.bf16.mxu0 %v674_v9  ;;  %653 = vmatprep.subr.bf16.mxu1 %v674_v9 }
  0x3a   :  { %629 = vmatpush3.bf16.msra.mxu0 %v674_v9  ;;  %661 = vmatpush3.bf16.msra.mxu1 %v674_v9 }
  0x3d   :  { %631 = vmatmul.mubr.bf16.vlgmr.msra.gmra.mxu0 %v677_v10  ;;  %639 = vmatmul.mubr.bf16.vlgmr.msra.gmra.mxu1 %v678_v11 }
  0x3e   :  { %634 = vmatprep.mubr.bf16.mxu0 %v679_v12  ;;  %642 = vmatprep.mubr.bf16.mxu1 %v680_v13 }
  0x45   :  { %635 = vmatmul.mubr.bf16.gmra.mxu0 %v681_v14  ;;  %643 = vmatmul.mubr.bf16.gmra.mxu1 %v682_v15 }
  0xfd   :  { %v632_v17 = vpop.f32.mrf.mxu0  ;;  %v640_v18 = vpop.f32.mrf.mxu1 }
  0xfe   :  { %v853_v19 = vadd.f32 %v632_v17, %v486_v16  ;;  %v855_v20 = vadd.f32 %v640_v18, %v486_v16 }
  0xff   :  { %v213_v21 = vpop.f32.mrf.mxu0  ;;  %v245_v22 = vpop.f32.mrf.mxu1 }
 0x100   :  { %v505_v23 = vmul.f32 -1.442695, %v853_v19  ;;  %v513_v24 = vmul.f32 -1.442695, %v855_v20  ;;  %v859_v25 = vadd.f32 %v486_v16, %v213_v21  ;;  %v861_v26 = vadd.f32 %v486_v16, %v245_v22 }
 0x101   :  { %v633_v27 = vpop.f32.mrf.mxu0  ;;  %v641_v28 = vpop.f32.mrf.mxu1 }
 0x102   :  { %683 = vpow2.f32 %v505_v23  ;;  %v503_v29 = vmul.f32 -1.442695, %v859_v25  ;;  %v511_v30 = vmul.f32 -1.442695, %v861_v26  ;;  %v865_v31 = vadd.f32 %v633_v27, %v486_v16 }
 0x103   :  { %685 = vpow2.f32 %v513_v24  ;;  %v867_v32 = vadd.f32 %v641_v28, %v486_v16  ;;  %v216_v33 = vpop.f32.mrf.mxu0  ;;  %v248_v34 = vpop.f32.mrf.mxu1 }
 0x104   :  { %687 = vpow2.f32 %v503_v29  ;;  %v506_v35 = vmul.f32 -1.442695, %v865_v31  ;;  %v870_v36 = vadd.f32 %v486_v16, %v216_v33  ;;  %v872_v37 = vadd.f32 %v486_v16, %v248_v34 }
 0x105   :  { %689 = vpow2.f32 %v511_v30  ;;  %v514_v38 = vmul.f32 -1.442695, %v867_v32  ;;  %v636_v39 = vpop.f32.mrf.mxu0  ;;  %v644_v40 = vpop.f32.mrf.mxu1 }
 0x106   :  { %691 = vpow2.f32 %v506_v35  ;;  %v504_v41 = vmul.f32 -1.442695, %v870_v36  ;;  %v512_v42 = vmul.f32 -1.442695, %v872_v37  ;;  %v877_v43 = vadd.f32 %v636_v39, %v486_v16 }
 0x107   :  { %693 = vpow2.f32 %v514_v38  ;;  %v879_v44 = vadd.f32 %v644_v40, %v486_v16  ;;  %v229_v45 = vpop.f32.mrf.mxu0  ;;  %v261_v46 = vpop.f32.mrf.mxu1 }
 0x108   :  { %695 = vpow2.f32 %v504_v41  ;;  %v509_v47 = vmul.f32 -1.442695, %v877_v43  ;;  %v882_v48 = vadd.f32 %v486_v16, %v229_v45  ;;  %v884_v49 = vadd.f32 %v486_v16, %v261_v46 }
 0x109   :  { %697 = vpow2.f32 %v512_v42  ;;  %v517_v50 = vmul.f32 -1.442695, %v879_v44  ;;  %v637_v51 = vpop.f32.mrf.mxu0  ;;  %v645_v52 = vpop.f32.mrf.mxu1 }
 0x10a   :  { %699 = vpow2.f32 %v509_v47  ;;  %v507_v53 = vmul.f32 -1.442695, %v882_v48  ;;  %v515_v54 = vmul.f32 -1.442695, %v884_v49  ;;  %v889_v55 = vadd.f32 %v637_v51, %v486_v16 }
 0x10b   :  { %701 = vpow2.f32 %v517_v50  ;;  %v891_v56 = vadd.f32 %v645_v52, %v486_v16  ;;  %v232_v57 = vpop.f32.mrf.mxu0  ;;  %v264_v58 = vpop.f32.mrf.mxu1 }
 0x10c   :  { %703 = vpow2.f32 %v507_v53  ;;  %v510_v59 = vmul.f32 -1.442695, %v889_v55  ;;  %v894_v60 = vadd.f32 %v486_v16, %v232_v57  ;;  %v896_v61 = vadd.f32 %v486_v16, %v264_v58 }
 0x10d   :  { %705 = vpow2.f32 %v515_v54  ;;  %v518_v62 = vmul.f32 -1.442695, %v891_v56 }
 0x10e   :  { %707 = vpow2.f32 %v510_v59  ;;  %v508_v63 = vmul.f32 -1.442695, %v894_v60  ;;  %v516_v0 = vmul.f32 -1.442695, %v896_v61 }
 0x10f   :  { %v684_v1 = vpop.eup %683  ;;  %709 = vpow2.f32 %v518_v62 }
 0x110   :  { %v686_v2 = vpop.eup %685  ;;  %v326_v3 = vadd.f32 1.0, %v684_v1  ;;  %711 = vpow2.f32 %v508_v63 }
 0x111   :  { %v688_v4 = vpop.eup %687  ;;  %v334_v5 = vadd.f32 1.0, %v686_v2  ;;  %713 = vpow2.f32 %v516_v0 }
 0x112   :  { %v690_v6 = vpop.eup %689  ;;  %715 = vrcp.f32 %v326_v3  ;;  %v324_v7 = vadd.f32 1.0, %v688_v4 }
 0x113   :  { %v692_v8 = vpop.eup %691  ;;  %717 = vrcp.f32 %v334_v5  ;;  %v332_v9 = vadd.f32 1.0, %v690_v6 }
 0x114   :  { %v694_v10 = vpop.eup %693  ;;  %719 = vrcp.f32 %v324_v7  ;;  %v327_v11 = vadd.f32 1.0, %v692_v8 }
 0x115   :  { %v696_v12 = vpop.eup %695  ;;  %721 = vrcp.f32 %v332_v9  ;;  %v335_v13 = vadd.f32 1.0, %v694_v10 }
 0x116   :  { %v698_v14 = vpop.eup %697  ;;  %723 = vrcp.f32 %v327_v11  ;;  %v325_v15 = vadd.f32 1.0, %v696_v12 }
 0x117   :  { %v700_v16 = vpop.eup %699  ;;  %725 = vrcp.f32 %v335_v13  ;;  %v333_v17 = vadd.f32 1.0, %v698_v14 }
 0x118   :  { %v702_v18 = vpop.eup %701  ;;  %727 = vrcp.f32 %v325_v15  ;;  %v330_v21 = vadd.f32 1.0, %v700_v16 }
 0x119   :  { %v704_v22 = vpop.eup %703  ;;  %729 = vrcp.f32 %v333_v17  ;;  %v338_v23 = vadd.f32 1.0, %v702_v18 }
 0x11a   :  { %v706_v24 = vpop.eup %705  ;;  %731 = vrcp.f32 %v330_v21  ;;  %v328_v27 = vadd.f32 1.0, %v704_v22 }
 0x11b   :  { %v708_v28 = vpop.eup %707  ;;  %733 = vrcp.f32 %v338_v23  ;;  %v336_v29 = vadd.f32 1.0, %v706_v24 }
 0x11c   :  { %v710_v30 = vpop.eup %709  ;;  %735 = vrcp.f32 %v328_v27  ;;  %v331_v33 = vadd.f32 1.0, %v708_v28 }
 0x11d   :  { %v712_v34 = vpop.eup %711  ;;  %737 = vrcp.f32 %v336_v29  ;;  %v339_v35 = vadd.f32 1.0, %v710_v30 }
 0x11e   :  { %v714_v38 = vpop.eup %713  ;;  %739 = vrcp.f32 %v331_v33  ;;  %v329_v39 = vadd.f32 1.0, %v712_v34 }
 0x11f   :  { %v716_v40 = vpop.eup %715  ;;  %741 = vrcp.f32 %v339_v35  ;;  %v337_v41 = vadd.f32 1.0, %v714_v38 }
 0x120   :  { %v718_v42 = vpop.eup %717  ;;  %743 = vrcp.f32 %v329_v39  ;;  %v374_v51 = vmul.f32 %v716_v40, %v853_v19 }
 0x121   :  { %v720_v45 = vpop.eup %719  ;;  %745 = vrcp.f32 %v337_v41  ;;  %v382_v54 = vmul.f32 %v718_v42, %v855_v20 }
 0x122   :  { %v722_v46 = vpop.eup %721  ;;  %v372_v59 = vmul.f32 %v720_v45, %v859_v25 }
 0x123   :  { %v724_v47 = vpop.eup %723  ;;  %v380_v1 = vmul.f32 %v722_v46, %v861_v26 }
 0x124   :  { %v726_v50 = vpop.eup %725  ;;  %v375_v52 = vmul.f32 %v724_v47, %v865_v31 }
 0x125   :  { %v728_v53 = vpop.eup %727  ;;  %v383_v57 = vmul.f32 %v726_v50, %v867_v32 }
 0x126   :  { %v730_v58 = vpop.eup %729  ;;  %v559_v62 = vpack.c.bf16 %v375_v52, %v374_v51  ;;  %v373_v63 = vmul.f32 %v728_v53, %v870_v36 }
 0x127   :  { %v732_v0 = vpop.eup %731  ;;  %v579_v2 = vpack.c.bf16 %v383_v57, %v382_v54  ;;  %v381_v3 = vmul.f32 %v730_v58, %v872_v37 }
 0x128   :  { %v734_v19 = vpop.eup %733  ;;  %591 = vst [vmem:[#allocation7 + $0x8] sm:$0xff] %v559_v62   ;;  %v554_v31 = vpack.c.bf16 %v373_v63, %v372_v59  ;;  %v378_v6 = vmul.f32 %v732_v0, %v877_v43 }
 0x129   :  { %v736_v4 = vpop.eup %735  ;;  %595 = vst [vmem:[#allocation7 + $0x28] sm:$0xff] %v579_v2   ;;  %v574_v20 = vpack.c.bf16 %v381_v3, %v380_v1  ;;  %v386_v26 = vmul.f32 %v734_v19, %v879_v44 }
 0x12a   :  { %v738_v5 = vpop.eup %737  ;;  %555 = vst [vmem:[#allocation7] sm:$0xff] %v554_v31   ;;  %v376_v9 = vmul.f32 %v736_v4, %v882_v48 }
 0x12b   :  { %v740_v32 = vpop.eup %739  ;;  %594 = vst [vmem:[#allocation7 + $0x20] sm:$0xff] %v574_v20   ;;  %v384_v12 = vmul.f32 %v738_v5, %v884_v49 }
 0x12c   :  { %v742_v25 = vpop.eup %741  ;;  %v379_v36 = vmul.f32 %v740_v32, %v889_v55 }
 0x12d   :  { %v744_v7 = vpop.eup %743  ;;  %v387_v37 = vmul.f32 %v742_v25, %v891_v56 }
 0x12e   :  { %v746_v8 = vpop.eup %745  ;;  %v569_v10 = vpack.c.bf16 %v379_v36, %v378_v6  ;;  %v377_v11 = vmul.f32 %v744_v7, %v894_v60 }
 0x12f   :  { %v589_v13 = vpack.c.bf16 %v387_v37, %v386_v26  ;;  %v385_v43 = vmul.f32 %v746_v8, %v896_v61 }
 0x130   :  { %593 = vst [vmem:[#allocation7 + $0x18] sm:$0xff] %v569_v10   ;;  %v564_v55 = vpack.c.bf16 %v377_v11, %v376_v9 }
 0x131   :  { %597 = vst [vmem:[#allocation7 + $0x38] sm:$0xff] %v589_v13   ;;  %v584_v14 = vpack.c.bf16 %v385_v43, %v384_v12 }
 0x132   :  { %592 = vst [vmem:[#allocation7 + $0x10] sm:$0xff] %v564_v55  }
 0x133   :  { %596 = vst [vmem:[#allocation7 + $0x30] sm:$0xff] %v584_v14  }
 0x134   :  { %798 = shalt.err (!%p795_p0)
}
 0x135   :  { %479 = dma.vmem_to_hbm [thread:$0]  %s474_s24, 1024, %s926_s3, [#allocation4], %s814_s15, %s814_s15, %s815_s16  }
 0x136   :  { %811 = dma.done.wait [#allocation4], 1024  }
 0x137   :  { %812 = vsyncadd [#allocation4], 4294966272 }
 0x138   :  { %483 = vsyncpa [#allocation3], 1 }
 0x139   :  { %484 = vsyncpa [#allocation6], 1 }
 0x13a   :  { %485 = vsyncpa [#allocation4], 1 }

</bundles_post_ra>
